<compile_context>
chip_gen: v7x
topology: tpu7x:2x2x1
jax: 0.10.0
libtpu: 0.0.40
codegen_flags: <defaults>
</compile_context>

<pallas_src>
import functools

import jax
import jax.numpy as jnp
from jax.experimental import pallas as pl
from jax.experimental.pallas import tpu as pltpu


def _teprnn_kernel(xt_ref, w_ih_s_ref, w_hh_s_ref, b_s_ref,
                   w2_t_ref, b2_ref, w3_t_ref, b3_ref, out_ref, hs_ref,
                   *, hid_dim):
    T, B = xt_ref.shape
    H = hid_dim

    xt = xt_ref[...]            # (T, B)   input, time-major
    w_ih_s = w_ih_s_ref[...]    # (1, 4H)  input projection, i/f/o columns pre-scaled by 0.5
    w_hh_s = w_hh_s_ref[...]    # (H, 4H)  recurrent weights^T, i/f/o columns pre-scaled by 0.5
    b_s = b_s_ref[...]          # (1, 4H)  (b_ih + b_hh), i/f/o columns pre-scaled by 0.5
    w2_t = w2_t_ref[...]        # (H, D2)
    b2 = b2_ref[...]            # (1, D2)
    w3_t = w3_t_ref[...]        # (D2, 1)
    b3 = b3_ref[...]            # (1, 1)
    D2 = w2_t.shape[1]

    # Hoisted out of the recurrence: input projection + bias for every timestep.
    # xb[t] == scale * (x_t * W_ih + b_ih + b_hh), scale = 0.5 on i/f/o cols, 1 on g cols.
    xb = (xt[:, :, None] * w_ih_s.reshape(1, 1, 4 * H)
          + b_s.reshape(1, 1, 4 * H))                      # (T, B, 4H)

    h = jnp.zeros((B, H), jnp.float32)
    c = jnp.zeros((B, H), jnp.float32)

    # T is small & static: fully unrolled time loop.  Per-step dependent chain is now
    # MXU dot -> add -> single full-vreg tanh (EUP) -> gate FMAs -> cell update ->
    # tanh(c) (EUP) -> h.  The h store and everything fc2-related are off the chain.
    for t in range(T):
        gates_s = xb[t] + jnp.dot(h, w_hh_s,
                                  preferred_element_type=jnp.float32)   # (B, 4H), scaled
        tg = jnp.tanh(gates_s)                # one EUP pass covers all four gates
        i_g = 0.5 * tg[:, 0 * H:1 * H] + 0.5  # sigmoid(z) = 0.5*tanh(z/2) + 0.5
        f_g = 0.5 * tg[:, 1 * H:2 * H] + 0.5
        g_g = tg[:, 2 * H:3 * H]              # g column was not pre-scaled -> plain tanh
        o_g = 0.5 * tg[:, 3 * H:4 * H] + 0.5
        c = f_g * c + i_g * g_g
        h = o_g * jnp.tanh(c)
        hs_ref[t * B:(t + 1) * B, :] = h      # stash h_t; store does not feed the recurrence

    # fc2 + tanh + time-sum + fc3, once, over all T steps at a time.
    h_all = hs_ref[...]                                                    # (T*B, H)
    fc2_all = jnp.tanh(jnp.dot(h_all, w2_t,
                               preferred_element_type=jnp.float32) + b2)   # (T*B, D2)
    acc = fc2_all[0:B, :]
    for t in range(1, T):
        acc = acc + fc2_all[t * B:(t + 1) * B, :]                          # (B, D2)
    out_ref[...] = jnp.dot(acc, w3_t, preferred_element_type=jnp.float32) + b3


def teprnn_forward(x, kernel_params, *, hid_dim):
    """x: (B, n_waypts) float32.  kernel_params from prepare_kernel_params()."""
    B, T = x.shape
    (w_ih_s, w_hh_s, b_s, w2_t, b2, w3_t, b3) = kernel_params
    kernel = functools.partial(_teprnn_kernel, hid_dim=hid_dim)
    vmem = pl.BlockSpec(memory_space=pltpu.MemorySpace.VMEM)
    # Single whole-array VMEM block, no grid: operands are tiny and the kernel is
    # latency-bound, so tiling / pipelining would only add overhead.
    return pl.pallas_call(
        kernel,
        out_shape=jax.ShapeDtypeStruct((B, 1), jnp.float32),
        in_specs=[vmem] * 8,
        out_specs=vmem,
        scratch_shapes=[pltpu.VMEM((T * B, hid_dim), jnp.float32)],
    )(jnp.transpose(x), w_ih_s, w_hh_s, b_s, w2_t, b2, w3_t, b3)


def init_params(key, hid_dim=32, hid_dim_2=6):
    """Raw PyTorch-shaped parameters.

    LSTM(input_size=1, hidden=hid_dim): weight_ih_l0 (4H,1), weight_hh_l0 (4H,H),
    bias_ih_l0 (4H,), bias_hh_l0 (4H,).  fc2: Linear(H, D2); fc3: Linear(D2, 1).
    """
    H, D2 = hid_dim, hid_dim_2
    ks = jax.random.split(key, 8)
    k_lstm = 1.0 / jnp.sqrt(H)
    w_ih = jax.random.uniform(ks[0], (4 * H, 1), jnp.float32, -k_lstm, k_lstm)
    w_hh = jax.random.uniform(ks[1], (4 * H, H), jnp.float32, -k_lstm, k_lstm)
    b_ih = jax.random.uniform(ks[2], (4 * H,), jnp.float32, -k_lstm, k_lstm)
    b_hh = jax.random.uniform(ks[3], (4 * H,), jnp.float32, -k_lstm, k_lstm)
    k2 = 1.0 / jnp.sqrt(H)
    w2 = jax.random.uniform(ks[4], (D2, H), jnp.float32, -k2, k2)
    b2 = jax.random.uniform(ks[5], (D2,), jnp.float32, -k2, k2)
    k3 = 1.0 / jnp.sqrt(D2)
    w3 = jax.random.uniform(ks[6], (1, D2), jnp.float32, -k3, k3)
    b3 = jax.random.uniform(ks[7], (1,), jnp.float32, -k3, k3)
    return (w_ih, w_hh, b_ih, b_hh, w2, b2, w3, b3)


def prepare_kernel_params(raw, *, hid_dim, hid_dim_2):
    """One-time layout prep for the kernel: transpose for row-major matmuls, fold the two
    LSTM biases, and pre-scale the i/f/o gate columns by 0.5 so the kernel evaluates all
    four gate nonlinearities with a single full-vreg tanh (sigmoid(z) = 0.5*tanh(z/2)+0.5).
    PyTorch gate order (i, f, g, o) is preserved."""
    H, D2 = hid_dim, hid_dim_2
    w_ih, w_hh, b_ih, b_hh, w2, b2, w3, b3 = raw
    scale = jnp.concatenate([
        jnp.full((H,), 0.5, jnp.float32),   # i
        jnp.full((H,), 0.5, jnp.float32),   # f
        jnp.ones((H,), jnp.float32),        # g (plain tanh)
        jnp.full((H,), 0.5, jnp.float32),   # o
    ])
    w_ih_s = w_ih.reshape(1, 4 * H) * scale[None, :]       # (1, 4H)
    w_hh_s = w_hh.T * scale[None, :]                       # (H, 4H)
    b_s = ((b_ih + b_hh) * scale).reshape(1, 4 * H)        # (1, 4H)
    return (w_ih_s, w_hh_s, b_s, w2.T, b2.reshape(1, D2), w3.T, b3.reshape(1, 1))


def teprnn_reference(x, raw, *, hid_dim):
    """Pure-JAX reference of the PyTorch forward (uses raw, unscaled params)."""
    w_ih, w_hh, b_ih, b_hh, w2, b2, w3, b3 = raw
    B, T = x.shape
    H = hid_dim
    h = jnp.zeros((B, H), jnp.float32)
    c = jnp.zeros((B, H), jnp.float32)
    acc = jnp.zeros((B, w2.shape[0]), jnp.float32)
    for t in range(T):
        gates = (x[:, t:t + 1] * w_ih.reshape(1, 4 * H)
                 + h @ w_hh.T + (b_ih + b_hh)[None, :])
        i_g = jax.nn.sigmoid(gates[:, :H])
        f_g = jax.nn.sigmoid(gates[:, H:2 * H])
        g_g = jnp.tanh(gates[:, 2 * H:3 * H])
        o_g = jax.nn.sigmoid(gates[:, 3 * H:])
        c = f_g * c + i_g * g_g
        h = o_g * jnp.tanh(c)
        acc = acc + jnp.tanh(h @ w2.T + b2[None, :])
    return acc @ w3.T + b3[None, :]


if __name__ == "__main__":
    B = 2
    N_WAYPTS = 8      # sequence length
    HID_DIM = 32
    HID_DIM_2 = 6

    key = jax.random.PRNGKey(0)
    k_x, k_p = jax.random.split(key)
    x = jax.random.normal(k_x, (B, N_WAYPTS), jnp.float32)

    raw_params = init_params(k_p, HID_DIM, HID_DIM_2)
    kernel_params = prepare_kernel_params(raw_params, hid_dim=HID_DIM, hid_dim_2=HID_DIM_2)

    out = teprnn_forward(x, kernel_params, hid_dim=HID_DIM)
    out = jax.block_until_ready(out)

    ref = teprnn_reference(x, raw_params, hid_dim=HID_DIM)
    assert out.shape == (B, 1)
    assert jnp.allclose(out, ref, rtol=1e-3, atol=1e-3)

    print("KERNEL_OK")
</pallas_src>

<mosaic_0001>
module attributes {stable_mosaic.version = 11 : i64} {
  func.func @_teprnn_kernel(%arg0: memref<8x2xf32, #tpu.memory_space<vmem>>, %arg1: memref<1x128xf32, #tpu.memory_space<vmem>>, %arg2: memref<32x128xf32, #tpu.memory_space<vmem>>, %arg3: memref<1x128xf32, #tpu.memory_space<vmem>>, %arg4: memref<32x6xf32, #tpu.memory_space<vmem>>, %arg5: memref<1x6xf32, #tpu.memory_space<vmem>>, %arg6: memref<6x1xf32, #tpu.memory_space<vmem>>, %arg7: memref<1x1xf32, #tpu.memory_space<vmem>>, %arg8: memref<2x1xf32, #tpu.memory_space<vmem>>, %arg9: memref<16x32xf32, #tpu.memory_space<vmem>>) attributes {dimension_semantics = [], scalar_prefetch = 0 : i64, scratch_operands = 1 : i64, tpu.core_type = #tpu.core_type<tc>} {
    %c0 = arith.constant 0 : index
    %c0_0 = arith.constant 0 : index
    %0 = vector.load %arg0[%c0, %c0_0] : memref<8x2xf32, #tpu.memory_space<vmem>>, vector<8x2xf32>
    %c0_1 = arith.constant 0 : index
    %c0_2 = arith.constant 0 : index
    %1 = vector.load %arg1[%c0_1, %c0_2] : memref<1x128xf32, #tpu.memory_space<vmem>>, vector<1x128xf32>
    %c0_3 = arith.constant 0 : index
    %c0_4 = arith.constant 0 : index
    %2 = vector.load %arg2[%c0_3, %c0_4] : memref<32x128xf32, #tpu.memory_space<vmem>>, vector<32x128xf32>
    %c0_5 = arith.constant 0 : index
    %c0_6 = arith.constant 0 : index
    %3 = vector.load %arg3[%c0_5, %c0_6] : memref<1x128xf32, #tpu.memory_space<vmem>>, vector<1x128xf32>
    %c0_7 = arith.constant 0 : index
    %c0_8 = arith.constant 0 : index
    %4 = vector.load %arg4[%c0_7, %c0_8] : memref<32x6xf32, #tpu.memory_space<vmem>>, vector<32x6xf32>
    %c0_9 = arith.constant 0 : index
    %c0_10 = arith.constant 0 : index
    %5 = vector.load %arg5[%c0_9, %c0_10] : memref<1x6xf32, #tpu.memory_space<vmem>>, vector<1x6xf32>
    %c0_11 = arith.constant 0 : index
    %c0_12 = arith.constant 0 : index
    %6 = vector.load %arg6[%c0_11, %c0_12] : memref<6x1xf32, #tpu.memory_space<vmem>>, vector<6x1xf32>
    %c0_13 = arith.constant 0 : index
    %c0_14 = arith.constant 0 : index
    %7 = vector.load %arg7[%c0_13, %c0_14] : memref<1x1xf32, #tpu.memory_space<vmem>>, vector<1x1xf32>
    %8 = vector.shape_cast %0 : vector<8x2xf32> to vector<8x2x1xf32>
    %9 = vector.shape_cast %1 : vector<1x128xf32> to vector<1x1x128xf32>
    %10 = vector.broadcast %8 : vector<8x2x1xf32> to vector<8x2x128xf32>
    %11 = vector.broadcast %9 : vector<1x1x128xf32> to vector<8x2x128xf32>
    %12 = arith.mulf %10, %11 : vector<8x2x128xf32>
    %13 = vector.shape_cast %3 : vector<1x128xf32> to vector<1x1x128xf32>
    %14 = vector.broadcast %13 : vector<1x1x128xf32> to vector<8x2x128xf32>
    %15 = arith.addf %12, %14 : vector<8x2x128xf32>
    %cst = arith.constant 0.000000e+00 : f32
    %16 = vector.broadcast %cst : f32 to vector<2x32xf32>
    %cst_15 = arith.constant 0.000000e+00 : f32
    %17 = vector.broadcast %cst_15 : f32 to vector<2x32xf32>
    %18 = vector.extract_strided_slice %15 {offsets = [0, 0, 0], sizes = [1, 2, 128], strides = [1, 1, 1]} : vector<8x2x128xf32> to vector<1x2x128xf32>
    %19 = vector.shape_cast %18 : vector<1x2x128xf32> to vector<2x128xf32>
    %cst_16 = arith.constant dense<0.000000e+00> : vector<2x128xf32>
    %20 = tpu.matmul %16, %2, %cst_16 {dimension_numbers = #tpu.dot_dimension_numbers<[1], [0], [0], [1], [0, 0, 1, 1], [], []>} : vector<2x32xf32>, vector<32x128xf32>, vector<2x128xf32> -> vector<2x128xf32>
    %21 = arith.addf %19, %20 : vector<2x128xf32>
    %22 = math.tanh %21 : vector<2x128xf32>
    %23 = vector.extract_strided_slice %22 {offsets = [0, 0], sizes = [2, 32], strides = [1, 1]} : vector<2x128xf32> to vector<2x32xf32>
    %cst_17 = arith.constant 5.000000e-01 : f32
    %24 = vector.broadcast %cst_17 : f32 to vector<2x32xf32>
    %25 = arith.mulf %24, %23 : vector<2x32xf32>
    %cst_18 = arith.constant 5.000000e-01 : f32
    %26 = vector.broadcast %cst_18 : f32 to vector<2x32xf32>
    %27 = arith.addf %25, %26 : vector<2x32xf32>
    %28 = vector.extract_strided_slice %22 {offsets = [0, 32], sizes = [2, 32], strides = [1, 1]} : vector<2x128xf32> to vector<2x32xf32>
    %cst_19 = arith.constant 5.000000e-01 : f32
    %29 = vector.broadcast %cst_19 : f32 to vector<2x32xf32>
    %30 = arith.mulf %29, %28 : vector<2x32xf32>
    %cst_20 = arith.constant 5.000000e-01 : f32
    %31 = vector.broadcast %cst_20 : f32 to vector<2x32xf32>
    %32 = arith.addf %30, %31 : vector<2x32xf32>
    %33 = vector.extract_strided_slice %22 {offsets = [0, 64], sizes = [2, 32], strides = [1, 1]} : vector<2x128xf32> to vector<2x32xf32>
    %34 = vector.extract_strided_slice %22 {offsets = [0, 96], sizes = [2, 32], strides = [1, 1]} : vector<2x128xf32> to vector<2x32xf32>
    %cst_21 = arith.constant 5.000000e-01 : f32
    %35 = vector.broadcast %cst_21 : f32 to vector<2x32xf32>
    %36 = arith.mulf %35, %34 : vector<2x32xf32>
    %cst_22 = arith.constant 5.000000e-01 : f32
    %37 = vector.broadcast %cst_22 : f32 to vector<2x32xf32>
    %38 = arith.addf %36, %37 : vector<2x32xf32>
    %39 = arith.mulf %32, %17 : vector<2x32xf32>
    %40 = arith.mulf %27, %33 : vector<2x32xf32>
    %41 = arith.addf %39, %40 : vector<2x32xf32>
    %42 = math.tanh %41 : vector<2x32xf32>
    %43 = arith.mulf %38, %42 : vector<2x32xf32>
    %c0_23 = arith.constant 0 : index
    %c0_24 = arith.constant 0 : index
    %44 = vector.load %arg9[%c0_23, %c0_24] : memref<16x32xf32, #tpu.memory_space<vmem>>, vector<2x32xf32>
    tpu.vector_store %arg9[%c0_23, %c0_24], %43 {strides = array<i32>} : memref<16x32xf32, #tpu.memory_space<vmem>>, vector<2x32xf32>,
    %45 = vector.extract_strided_slice %15 {offsets = [1, 0, 0], sizes = [1, 2, 128], strides = [1, 1, 1]} : vector<8x2x128xf32> to vector<1x2x128xf32>
    %46 = vector.shape_cast %45 : vector<1x2x128xf32> to vector<2x128xf32>
    %cst_25 = arith.constant dense<0.000000e+00> : vector<2x128xf32>
    %47 = tpu.matmul %43, %2, %cst_25 {dimension_numbers = #tpu.dot_dimension_numbers<[1], [0], [0], [1], [0, 0, 1, 1], [], []>} : vector<2x32xf32>, vector<32x128xf32>, vector<2x128xf32> -> vector<2x128xf32>
    %48 = arith.addf %46, %47 : vector<2x128xf32>
    %49 = math.tanh %48 : vector<2x128xf32>
    %50 = vector.extract_strided_slice %49 {offsets = [0, 0], sizes = [2, 32], strides = [1, 1]} : vector<2x128xf32> to vector<2x32xf32>
    %cst_26 = arith.constant 5.000000e-01 : f32
    %51 = vector.broadcast %cst_26 : f32 to vector<2x32xf32>
    %52 = arith.mulf %51, %50 : vector<2x32xf32>
    %cst_27 = arith.constant 5.000000e-01 : f32
    %53 = vector.broadcast %cst_27 : f32 to vector<2x32xf32>
    %54 = arith.addf %52, %53 : vector<2x32xf32>
    %55 = vector.extract_strided_slice %49 {offsets = [0, 32], sizes = [2, 32], strides = [1, 1]} : vector<2x128xf32> to vector<2x32xf32>
    %cst_28 = arith.constant 5.000000e-01 : f32
    %56 = vector.broadcast %cst_28 : f32 to vector<2x32xf32>
    %57 = arith.mulf %56, %55 : vector<2x32xf32>
    %cst_29 = arith.constant 5.000000e-01 : f32
    %58 = vector.broadcast %cst_29 : f32 to vector<2x32xf32>
    %59 = arith.addf %57, %58 : vector<2x32xf32>
    %60 = vector.extract_strided_slice %49 {offsets = [0, 64], sizes = [2, 32], strides = [1, 1]} : vector<2x128xf32> to vector<2x32xf32>
    %61 = vector.extract_strided_slice %49 {offsets = [0, 96], sizes = [2, 32], strides = [1, 1]} : vector<2x128xf32> to vector<2x32xf32>
    %cst_30 = arith.constant 5.000000e-01 : f32
    %62 = vector.broadcast %cst_30 : f32 to vector<2x32xf32>
    %63 = arith.mulf %62, %61 : vector<2x32xf32>
    %cst_31 = arith.constant 5.000000e-01 : f32
    %64 = vector.broadcast %cst_31 : f32 to vector<2x32xf32>
    %65 = arith.addf %63, %64 : vector<2x32xf32>
    %66 = arith.mulf %59, %41 : vector<2x32xf32>
    %67 = arith.mulf %54, %60 : vector<2x32xf32>
    %68 = arith.addf %66, %67 : vector<2x32xf32>
    %69 = math.tanh %68 : vector<2x32xf32>
    %70 = arith.mulf %65, %69 : vector<2x32xf32>
    %c2 = arith.constant 2 : index
    %c0_32 = arith.constant 0 : index
    %71 = vector.load %arg9[%c2, %c0_32] : memref<16x32xf32, #tpu.memory_space<vmem>>, vector<2x32xf32>
    tpu.vector_store %arg9[%c2, %c0_32], %70 {strides = array<i32>} : memref<16x32xf32, #tpu.memory_space<vmem>>, vector<2x32xf32>,
    %72 = vector.extract_strided_slice %15 {offsets = [2, 0, 0], sizes = [1, 2, 128], strides = [1, 1, 1]} : vector<8x2x128xf32> to vector<1x2x128xf32>
    %73 = vector.shape_cast %72 : vector<1x2x128xf32> to vector<2x128xf32>
    %cst_33 = arith.constant dense<0.000000e+00> : vector<2x128xf32>
    %74 = tpu.matmul %70, %2, %cst_33 {dimension_numbers = #tpu.dot_dimension_numbers<[1], [0], [0], [1], [0, 0, 1, 1], [], []>} : vector<2x32xf32>, vector<32x128xf32>, vector<2x128xf32> -> vector<2x128xf32>
    %75 = arith.addf %73, %74 : vector<2x128xf32>
    %76 = math.tanh %75 : vector<2x128xf32>
    %77 = vector.extract_strided_slice %76 {offsets = [0, 0], sizes = [2, 32], strides = [1, 1]} : vector<2x128xf32> to vector<2x32xf32>
    %cst_34 = arith.constant 5.000000e-01 : f32
    %78 = vector.broadcast %cst_34 : f32 to vector<2x32xf32>
    %79 = arith.mulf %78, %77 : vector<2x32xf32>
    %cst_35 = arith.constant 5.000000e-01 : f32
    %80 = vector.broadcast %cst_35 : f32 to vector<2x32xf32>
    %81 = arith.addf %79, %80 : vector<2x32xf32>
    %82 = vector.extract_strided_slice %76 {offsets = [0, 32], sizes = [2, 32], strides = [1, 1]} : vector<2x128xf32> to vector<2x32xf32>
    %cst_36 = arith.constant 5.000000e-01 : f32
    %83 = vector.broadcast %cst_36 : f32 to vector<2x32xf32>
    %84 = arith.mulf %83, %82 : vector<2x32xf32>
    %cst_37 = arith.constant 5.000000e-01 : f32
    %85 = vector.broadcast %cst_37 : f32 to vector<2x32xf32>
    %86 = arith.addf %84, %85 : vector<2x32xf32>
    %87 = vector.extract_strided_slice %76 {offsets = [0, 64], sizes = [2, 32], strides = [1, 1]} : vector<2x128xf32> to vector<2x32xf32>
    %88 = vector.extract_strided_slice %76 {offsets = [0, 96], sizes = [2, 32], strides = [1, 1]} : vector<2x128xf32> to vector<2x32xf32>
    %cst_38 = arith.constant 5.000000e-01 : f32
    %89 = vector.broadcast %cst_38 : f32 to vector<2x32xf32>
    %90 = arith.mulf %89, %88 : vector<2x32xf32>
    %cst_39 = arith.constant 5.000000e-01 : f32
    %91 = vector.broadcast %cst_39 : f32 to vector<2x32xf32>
    %92 = arith.addf %90, %91 : vector<2x32xf32>
    %93 = arith.mulf %86, %68 : vector<2x32xf32>
    %94 = arith.mulf %81, %87 : vector<2x32xf32>
    %95 = arith.addf %93, %94 : vector<2x32xf32>
    %96 = math.tanh %95 : vector<2x32xf32>
    %97 = arith.mulf %92, %96 : vector<2x32xf32>
    %c4 = arith.constant 4 : index
    %c0_40 = arith.constant 0 : index
    %98 = vector.load %arg9[%c4, %c0_40] : memref<16x32xf32, #tpu.memory_space<vmem>>, vector<2x32xf32>
    tpu.vector_store %arg9[%c4, %c0_40], %97 {strides = array<i32>} : memref<16x32xf32, #tpu.memory_space<vmem>>, vector<2x32xf32>,
    %99 = vector.extract_strided_slice %15 {offsets = [3, 0, 0], sizes = [1, 2, 128], strides = [1, 1, 1]} : vector<8x2x128xf32> to vector<1x2x128xf32>
    %100 = vector.shape_cast %99 : vector<1x2x128xf32> to vector<2x128xf32>
    %cst_41 = arith.constant dense<0.000000e+00> : vector<2x128xf32>
    %101 = tpu.matmul %97, %2, %cst_41 {dimension_numbers = #tpu.dot_dimension_numbers<[1], [0], [0], [1], [0, 0, 1, 1], [], []>} : vector<2x32xf32>, vector<32x128xf32>, vector<2x128xf32> -> vector<2x128xf32>
    %102 = arith.addf %100, %101 : vector<2x128xf32>
    %103 = math.tanh %102 : vector<2x128xf32>
    %104 = vector.extract_strided_slice %103 {offsets = [0, 0], sizes = [2, 32], strides = [1, 1]} : vector<2x128xf32> to vector<2x32xf32>
    %cst_42 = arith.constant 5.000000e-01 : f32
    %105 = vector.broadcast %cst_42 : f32 to vector<2x32xf32>
    %106 = arith.mulf %105, %104 : vector<2x32xf32>
    %cst_43 = arith.constant 5.000000e-01 : f32
    %107 = vector.broadcast %cst_43 : f32 to vector<2x32xf32>
    %108 = arith.addf %106, %107 : vector<2x32xf32>
    %109 = vector.extract_strided_slice %103 {offsets = [0, 32], sizes = [2, 32], strides = [1, 1]} : vector<2x128xf32> to vector<2x32xf32>
    %cst_44 = arith.constant 5.000000e-01 : f32
    %110 = vector.broadcast %cst_44 : f32 to vector<2x32xf32>
    %111 = arith.mulf %110, %109 : vector<2x32xf32>
    %cst_45 = arith.constant 5.000000e-01 : f32
    %112 = vector.broadcast %cst_45 : f32 to vector<2x32xf32>
    %113 = arith.addf %111, %112 : vector<2x32xf32>
    %114 = vector.extract_strided_slice %103 {offsets = [0, 64], sizes = [2, 32], strides = [1, 1]} : vector<2x128xf32> to vector<2x32xf32>
    %115 = vector.extract_strided_slice %103 {offsets = [0, 96], sizes = [2, 32], strides = [1, 1]} : vector<2x128xf32> to vector<2x32xf32>
    %cst_46 = arith.constant 5.000000e-01 : f32
    %116 = vector.broadcast %cst_46 : f32 to vector<2x32xf32>
    %117 = arith.mulf %116, %115 : vector<2x32xf32>
    %cst_47 = arith.constant 5.000000e-01 : f32
    %118 = vector.broadcast %cst_47 : f32 to vector<2x32xf32>
    %119 = arith.addf %117, %118 : vector<2x32xf32>
    %120 = arith.mulf %113, %95 : vector<2x32xf32>
    %121 = arith.mulf %108, %114 : vector<2x32xf32>
    %122 = arith.addf %120, %121 : vector<2x32xf32>
    %123 = math.tanh %122 : vector<2x32xf32>
    %124 = arith.mulf %119, %123 : vector<2x32xf32>
    %c6 = arith.constant 6 : index
    %c0_48 = arith.constant 0 : index
    %125 = vector.load %arg9[%c6, %c0_48] : memref<16x32xf32, #tpu.memory_space<vmem>>, vector<2x32xf32>
    tpu.vector_store %arg9[%c6, %c0_48], %124 {strides = array<i32>} : memref<16x32xf32, #tpu.memory_space<vmem>>, vector<2x32xf32>,
    %126 = vector.extract_strided_slice %15 {offsets = [4, 0, 0], sizes = [1, 2, 128], strides = [1, 1, 1]} : vector<8x2x128xf32> to vector<1x2x128xf32>
    %127 = vector.shape_cast %126 : vector<1x2x128xf32> to vector<2x128xf32>
    %cst_49 = arith.constant dense<0.000000e+00> : vector<2x128xf32>
    %128 = tpu.matmul %124, %2, %cst_49 {dimension_numbers = #tpu.dot_dimension_numbers<[1], [0], [0], [1], [0, 0, 1, 1], [], []>} : vector<2x32xf32>, vector<32x128xf32>, vector<2x128xf32> -> vector<2x128xf32>
    %129 = arith.addf %127, %128 : vector<2x128xf32>
    %130 = math.tanh %129 : vector<2x128xf32>
    %131 = vector.extract_strided_slice %130 {offsets = [0, 0], sizes = [2, 32], strides = [1, 1]} : vector<2x128xf32> to vector<2x32xf32>
    %cst_50 = arith.constant 5.000000e-01 : f32
    %132 = vector.broadcast %cst_50 : f32 to vector<2x32xf32>
    %133 = arith.mulf %132, %131 : vector<2x32xf32>
    %cst_51 = arith.constant 5.000000e-01 : f32
    %134 = vector.broadcast %cst_51 : f32 to vector<2x32xf32>
    %135 = arith.addf %133, %134 : vector<2x32xf32>
    %136 = vector.extract_strided_slice %130 {offsets = [0, 32], sizes = [2, 32], strides = [1, 1]} : vector<2x128xf32> to vector<2x32xf32>
    %cst_52 = arith.constant 5.000000e-01 : f32
    %137 = vector.broadcast %cst_52 : f32 to vector<2x32xf32>
    %138 = arith.mulf %137, %136 : vector<2x32xf32>
    %cst_53 = arith.constant 5.000000e-01 : f32
    %139 = vector.broadcast %cst_53 : f32 to vector<2x32xf32>
    %140 = arith.addf %138, %139 : vector<2x32xf32>
    %141 = vector.extract_strided_slice %130 {offsets = [0, 64], sizes = [2, 32], strides = [1, 1]} : vector<2x128xf32> to vector<2x32xf32>
    %142 = vector.extract_strided_slice %130 {offsets = [0, 96], sizes = [2, 32], strides = [1, 1]} : vector<2x128xf32> to vector<2x32xf32>
    %cst_54 = arith.constant 5.000000e-01 : f32
    %143 = vector.broadcast %cst_54 : f32 to vector<2x32xf32>
    %144 = arith.mulf %143, %142 : vector<2x32xf32>
    %cst_55 = arith.constant 5.000000e-01 : f32
    %145 = vector.broadcast %cst_55 : f32 to vector<2x32xf32>
    %146 = arith.addf %144, %145 : vector<2x32xf32>
    %147 = arith.mulf %140, %122 : vector<2x32xf32>
    %148 = arith.mulf %135, %141 : vector<2x32xf32>
    %149 = arith.addf %147, %148 : vector<2x32xf32>
    %150 = math.tanh %149 : vector<2x32xf32>
    %151 = arith.mulf %146, %150 : vector<2x32xf32>
    %c8 = arith.constant 8 : index
    %c0_56 = arith.constant 0 : index
    %152 = vector.load %arg9[%c8, %c0_56] : memref<16x32xf32, #tpu.memory_space<vmem>>, vector<2x32xf32>
    tpu.vector_store %arg9[%c8, %c0_56], %151 {strides = array<i32>} : memref<16x32xf32, #tpu.memory_space<vmem>>, vector<2x32xf32>,
    %153 = vector.extract_strided_slice %15 {offsets = [5, 0, 0], sizes = [1, 2, 128], strides = [1, 1, 1]} : vector<8x2x128xf32> to vector<1x2x128xf32>
    %154 = vector.shape_cast %153 : vector<1x2x128xf32> to vector<2x128xf32>
    %cst_57 = arith.constant dense<0.000000e+00> : vector<2x128xf32>
    %155 = tpu.matmul %151, %2, %cst_57 {dimension_numbers = #tpu.dot_dimension_numbers<[1], [0], [0], [1], [0, 0, 1, 1], [], []>} : vector<2x32xf32>, vector<32x128xf32>, vector<2x128xf32> -> vector<2x128xf32>
    %156 = arith.addf %154, %155 : vector<2x128xf32>
    %157 = math.tanh %156 : vector<2x128xf32>
    %158 = vector.extract_strided_slice %157 {offsets = [0, 0], sizes = [2, 32], strides = [1, 1]} : vector<2x128xf32> to vector<2x32xf32>
    %cst_58 = arith.constant 5.000000e-01 : f32
    %159 = vector.broadcast %cst_58 : f32 to vector<2x32xf32>
    %160 = arith.mulf %159, %158 : vector<2x32xf32>
    %cst_59 = arith.constant 5.000000e-01 : f32
    %161 = vector.broadcast %cst_59 : f32 to vector<2x32xf32>
    %162 = arith.addf %160, %161 : vector<2x32xf32>
    %163 = vector.extract_strided_slice %157 {offsets = [0, 32], sizes = [2, 32], strides = [1, 1]} : vector<2x128xf32> to vector<2x32xf32>
    %cst_60 = arith.constant 5.000000e-01 : f32
    %164 = vector.broadcast %cst_60 : f32 to vector<2x32xf32>
    %165 = arith.mulf %164, %163 : vector<2x32xf32>
    %cst_61 = arith.constant 5.000000e-01 : f32
    %166 = vector.broadcast %cst_61 : f32 to vector<2x32xf32>
    %167 = arith.addf %165, %166 : vector<2x32xf32>
    %168 = vector.extract_strided_slice %157 {offsets = [0, 64], sizes = [2, 32], strides = [1, 1]} : vector<2x128xf32> to vector<2x32xf32>
    %169 = vector.extract_strided_slice %157 {offsets = [0, 96], sizes = [2, 32], strides = [1, 1]} : vector<2x128xf32> to vector<2x32xf32>
    %cst_62 = arith.constant 5.000000e-01 : f32
    %170 = vector.broadcast %cst_62 : f32 to vector<2x32xf32>
    %171 = arith.mulf %170, %169 : vector<2x32xf32>
    %cst_63 = arith.constant 5.000000e-01 : f32
    %172 = vector.broadcast %cst_63 : f32 to vector<2x32xf32>
    %173 = arith.addf %171, %172 : vector<2x32xf32>
    %174 = arith.mulf %167, %149 : vector<2x32xf32>
    %175 = arith.mulf %162, %168 : vector<2x32xf32>
    %176 = arith.addf %174, %175 : vector<2x32xf32>
    %177 = math.tanh %176 : vector<2x32xf32>
    %178 = arith.mulf %173, %177 : vector<2x32xf32>
    %c10 = arith.constant 10 : index
    %c0_64 = arith.constant 0 : index
    %179 = vector.load %arg9[%c10, %c0_64] : memref<16x32xf32, #tpu.memory_space<vmem>>, vector<2x32xf32>
    tpu.vector_store %arg9[%c10, %c0_64], %178 {strides = array<i32>} : memref<16x32xf32, #tpu.memory_space<vmem>>, vector<2x32xf32>,
    %180 = vector.extract_strided_slice %15 {offsets = [6, 0, 0], sizes = [1, 2, 128], strides = [1, 1, 1]} : vector<8x2x128xf32> to vector<1x2x128xf32>
    %181 = vector.shape_cast %180 : vector<1x2x128xf32> to vector<2x128xf32>
    %cst_65 = arith.constant dense<0.000000e+00> : vector<2x128xf32>
    %182 = tpu.matmul %178, %2, %cst_65 {dimension_numbers = #tpu.dot_dimension_numbers<[1], [0], [0], [1], [0, 0, 1, 1], [], []>} : vector<2x32xf32>, vector<32x128xf32>, vector<2x128xf32> -> vector<2x128xf32>
    %183 = arith.addf %181, %182 : vector<2x128xf32>
    %184 = math.tanh %183 : vector<2x128xf32>
    %185 = vector.extract_strided_slice %184 {offsets = [0, 0], sizes = [2, 32], strides = [1, 1]} : vector<2x128xf32> to vector<2x32xf32>
    %cst_66 = arith.constant 5.000000e-01 : f32
    %186 = vector.broadcast %cst_66 : f32 to vector<2x32xf32>
    %187 = arith.mulf %186, %185 : vector<2x32xf32>
    %cst_67 = arith.constant 5.000000e-01 : f32
    %188 = vector.broadcast %cst_67 : f32 to vector<2x32xf32>
    %189 = arith.addf %187, %188 : vector<2x32xf32>
    %190 = vector.extract_strided_slice %184 {offsets = [0, 32], sizes = [2, 32], strides = [1, 1]} : vector<2x128xf32> to vector<2x32xf32>
    %cst_68 = arith.constant 5.000000e-01 : f32
    %191 = vector.broadcast %cst_68 : f32 to vector<2x32xf32>
    %192 = arith.mulf %191, %190 : vector<2x32xf32>
    %cst_69 = arith.constant 5.000000e-01 : f32
    %193 = vector.broadcast %cst_69 : f32 to vector<2x32xf32>
    %194 = arith.addf %192, %193 : vector<2x32xf32>
    %195 = vector.extract_strided_slice %184 {offsets = [0, 64], sizes = [2, 32], strides = [1, 1]} : vector<2x128xf32> to vector<2x32xf32>
    %196 = vector.extract_strided_slice %184 {offsets = [0, 96], sizes = [2, 32], strides = [1, 1]} : vector<2x128xf32> to vector<2x32xf32>
    %cst_70 = arith.constant 5.000000e-01 : f32
    %197 = vector.broadcast %cst_70 : f32 to vector<2x32xf32>
    %198 = arith.mulf %197, %196 : vector<2x32xf32>
    %cst_71 = arith.constant 5.000000e-01 : f32
    %199 = vector.broadcast %cst_71 : f32 to vector<2x32xf32>
    %200 = arith.addf %198, %199 : vector<2x32xf32>
    %201 = arith.mulf %194, %176 : vector<2x32xf32>
    %202 = arith.mulf %189, %195 : vector<2x32xf32>
    %203 = arith.addf %201, %202 : vector<2x32xf32>
    %204 = math.tanh %203 : vector<2x32xf32>
    %205 = arith.mulf %200, %204 : vector<2x32xf32>
    %c12 = arith.constant 12 : index
    %c0_72 = arith.constant 0 : index
    %206 = vector.load %arg9[%c12, %c0_72] : memref<16x32xf32, #tpu.memory_space<vmem>>, vector<2x32xf32>
    tpu.vector_store %arg9[%c12, %c0_72], %205 {strides = array<i32>} : memref<16x32xf32, #tpu.memory_space<vmem>>, vector<2x32xf32>,
    %207 = vector.extract_strided_slice %15 {offsets = [7, 0, 0], sizes = [1, 2, 128], strides = [1, 1, 1]} : vector<8x2x128xf32> to vector<1x2x128xf32>
    %208 = vector.shape_cast %207 : vector<1x2x128xf32> to vector<2x128xf32>
    %cst_73 = arith.constant dense<0.000000e+00> : vector<2x128xf32>
    %209 = tpu.matmul %205, %2, %cst_73 {dimension_numbers = #tpu.dot_dimension_numbers<[1], [0], [0], [1], [0, 0, 1, 1], [], []>} : vector<2x32xf32>, vector<32x128xf32>, vector<2x128xf32> -> vector<2x128xf32>
    %210 = arith.addf %208, %209 : vector<2x128xf32>
    %211 = math.tanh %210 : vector<2x128xf32>
    %212 = vector.extract_strided_slice %211 {offsets = [0, 0], sizes = [2, 32], strides = [1, 1]} : vector<2x128xf32> to vector<2x32xf32>
    %cst_74 = arith.constant 5.000000e-01 : f32
    %213 = vector.broadcast %cst_74 : f32 to vector<2x32xf32>
    %214 = arith.mulf %213, %212 : vector<2x32xf32>
    %cst_75 = arith.constant 5.000000e-01 : f32
    %215 = vector.broadcast %cst_75 : f32 to vector<2x32xf32>
    %216 = arith.addf %214, %215 : vector<2x32xf32>
    %217 = vector.extract_strided_slice %211 {offsets = [0, 32], sizes = [2, 32], strides = [1, 1]} : vector<2x128xf32> to vector<2x32xf32>
    %cst_76 = arith.constant 5.000000e-01 : f32
    %218 = vector.broadcast %cst_76 : f32 to vector<2x32xf32>
    %219 = arith.mulf %218, %217 : vector<2x32xf32>
    %cst_77 = arith.constant 5.000000e-01 : f32
    %220 = vector.broadcast %cst_77 : f32 to vector<2x32xf32>
    %221 = arith.addf %219, %220 : vector<2x32xf32>
    %222 = vector.extract_strided_slice %211 {offsets = [0, 64], sizes = [2, 32], strides = [1, 1]} : vector<2x128xf32> to vector<2x32xf32>
    %223 = vector.extract_strided_slice %211 {offsets = [0, 96], sizes = [2, 32], strides = [1, 1]} : vector<2x128xf32> to vector<2x32xf32>
    %cst_78 = arith.constant 5.000000e-01 : f32
    %224 = vector.broadcast %cst_78 : f32 to vector<2x32xf32>
    %225 = arith.mulf %224, %223 : vector<2x32xf32>
    %cst_79 = arith.constant 5.000000e-01 : f32
    %226 = vector.broadcast %cst_79 : f32 to vector<2x32xf32>
    %227 = arith.addf %225, %226 : vector<2x32xf32>
    %228 = arith.mulf %221, %203 : vector<2x32xf32>
    %229 = arith.mulf %216, %222 : vector<2x32xf32>
    %230 = arith.addf %228, %229 : vector<2x32xf32>
    %231 = math.tanh %230 : vector<2x32xf32>
    %232 = arith.mulf %227, %231 : vector<2x32xf32>
    %c14 = arith.constant 14 : index
    %c0_80 = arith.constant 0 : index
    %233 = vector.load %arg9[%c14, %c0_80] : memref<16x32xf32, #tpu.memory_space<vmem>>, vector<2x32xf32>
    tpu.vector_store %arg9[%c14, %c0_80], %232 {strides = array<i32>} : memref<16x32xf32, #tpu.memory_space<vmem>>, vector<2x32xf32>,
    %c0_81 = arith.constant 0 : index
    %c0_82 = arith.constant 0 : index
    %234 = vector.load %arg9[%c0_81, %c0_82] : memref<16x32xf32, #tpu.memory_space<vmem>>, vector<16x32xf32>
    %cst_83 = arith.constant dense<0.000000e+00> : vector<16x6xf32>
    %235 = tpu.matmul %234, %4, %cst_83 {dimension_numbers = #tpu.dot_dimension_numbers<[1], [0], [0], [1], [0, 0, 1, 1], [], []>} : vector<16x32xf32>, vector<32x6xf32>, vector<16x6xf32> -> vector<16x6xf32>
    %236 = vector.broadcast %5 : vector<1x6xf32> to vector<16x6xf32>
    %237 = arith.addf %235, %236 : vector<16x6xf32>
    %238 = math.tanh %237 : vector<16x6xf32>
    %239 = vector.extract_strided_slice %238 {offsets = [0, 0], sizes = [2, 6], strides = [1, 1]} : vector<16x6xf32> to vector<2x6xf32>
    %240 = vector.extract_strided_slice %238 {offsets = [2, 0], sizes = [2, 6], strides = [1, 1]} : vector<16x6xf32> to vector<2x6xf32>
    %241 = arith.addf %239, %240 : vector<2x6xf32>
    %242 = vector.extract_strided_slice %238 {offsets = [4, 0], sizes = [2, 6], strides = [1, 1]} : vector<16x6xf32> to vector<2x6xf32>
    %243 = arith.addf %241, %242 : vector<2x6xf32>
    %244 = vector.extract_strided_slice %238 {offsets = [6, 0], sizes = [2, 6], strides = [1, 1]} : vector<16x6xf32> to vector<2x6xf32>
    %245 = arith.addf %243, %244 : vector<2x6xf32>
    %246 = vector.extract_strided_slice %238 {offsets = [8, 0], sizes = [2, 6], strides = [1, 1]} : vector<16x6xf32> to vector<2x6xf32>
    %247 = arith.addf %245, %246 : vector<2x6xf32>
    %248 = vector.extract_strided_slice %238 {offsets = [10, 0], sizes = [2, 6], strides = [1, 1]} : vector<16x6xf32> to vector<2x6xf32>
    %249 = arith.addf %247, %248 : vector<2x6xf32>
    %250 = vector.extract_strided_slice %238 {offsets = [12, 0], sizes = [2, 6], strides = [1, 1]} : vector<16x6xf32> to vector<2x6xf32>
    %251 = arith.addf %249, %250 : vector<2x6xf32>
    %252 = vector.extract_strided_slice %238 {offsets = [14, 0], sizes = [2, 6], strides = [1, 1]} : vector<16x6xf32> to vector<2x6xf32>
    %253 = arith.addf %251, %252 : vector<2x6xf32>
    %cst_84 = arith.constant dense<0.000000e+00> : vector<2x1xf32>
    %254 = tpu.matmul %253, %6, %cst_84 {dimension_numbers = #tpu.dot_dimension_numbers<[1], [0], [0], [1], [0, 0, 1, 1], [], []>} : vector<2x6xf32>, vector<6x1xf32>, vector<2x1xf32> -> vector<2x1xf32>
    %255 = vector.broadcast %7 : vector<1x1xf32> to vector<2x1xf32>
    %256 = arith.addf %254, %255 : vector<2x1xf32>
    %c0_85 = arith.constant 0 : index
    %c0_86 = arith.constant 0 : index
    %257 = vector.load %arg8[%c0_85, %c0_86] : memref<2x1xf32, #tpu.memory_space<vmem>>, vector<2x1xf32>
    tpu.vector_store %arg8[%c0_85, %c0_86], %256 {strides = array<i32>} : memref<2x1xf32, #tpu.memory_space<vmem>>, vector<2x1xf32>,
    return
  }
}

</mosaic_0001>

<bundles_post_ra>
// kernel: tpu_custom_call.1
= control target key start
LH: loop header
LB: loop body
LE: loop exit
PB: predicated region body
PF: predicated region fallthrough
CT: control target
= control target key end

     0   :  { %v45_v0 = vlaneseq  ;;  %v1382_v1 = vmov 0.0|0.0   ;;  %vm1383_vm0 = vmmov 0   ;;  %v1384_v5 = vmov 0.0   ;;  %s1385_s17 = smov 64   ;;  %s1622_s2 = inlined_call_operand.vmem [shape: f32[32,128], index: 2, kind: input, shape index: {}]   ;;  %s1623_s0 = inlined_call_operand.vmem [shape: f32[8,2], index: 0, kind: input, shape index: {}]   ;;  %s1624_s1 = inlined_call_operand.vmem [shape: f32[1,128], index: 1, kind: input, shape index: {}]   ;;  %s1625_s3 = inlined_call_operand.vmem [shape: f32[1,128], index: 3, kind: input, shape index: {}]   ;;  %s1626_s4 = inlined_call_operand.vmem [shape: f32[32,6], index: 4, kind: input, shape index: {}]   ;;  %s1627_s6 = inlined_call_operand.vmem [shape: f32[6,1], index: 6, kind: input, shape index: {}]   ;;  %s1628_s7 = inlined_call_operand.<no memory space> [shape: f32[1,1], index: 7, kind: input, shape index: {}]   ;;  %s1629_s5 = inlined_call_operand.vmem [shape: f32[1,6], index: 5, kind: input, shape index: {}]   ;;  %s1630_s8 = inlined_call_operand.vmem [shape: f32[2,1], index: 8, kind: output, shape index: {}]  }
   0x1   :  { %1285 = vmatprep.subr.bf16.mxu0 %v1382_v1  ;;  %v33_v2 = vld [vmem:[%s1622_s2] sm:$0xff]  ;;  %v34_v3 = vld [vmem:[%s1622_s2 + $0x8] sm:$0xff]  ;;  %v35_v4 = vld [vmem:[%s1622_s2 + $0x10] sm:$0xff]  ;;  %1189 = vmatprep.mubr.msk.f32.mxu0 %vm1383_vm0, %v1384_v5  ;;  %vm228_vm1 = vcmask 254976   ;;  %vm129_vm2 = vcmask 261120   ;;  %vm1038_vm3 = vcmask 1045504  }
   0x2   :  { %v1444_v6 = vpack.c.bf16 %v34_v3, %v33_v2  ;;  %v36_v7 = vld [vmem:[%s1622_s2 + $0x18] sm:$0xff]  ;;  %v1449_v8 = vshrl.u32 %v45_v0, 7  ;;  %1291 = vmatprep.subr.bf16.mxu1 %v1382_v1  ;;  %1200 = vmatprep.mubr.msk.f32.mxu1 %vm1383_vm0, %v1384_v5  ;;  %v1457_v9 = vld [vmem:[%s1623_s0] sm:$0xff]  ;;  %vm1034_vm4 = vcmask 48128   ;;  %vm1112_vm5 = vcmask 1024  }
   0x3   :  { %v1460_v10 = vpack.c.bf16 %v36_v7, %v35_v4  ;;  %v1481_v13 = vld [vmem:[%s1624_s1] ss:$0 sm:$0xff]  ;;  %s1386_s1 = smov 32  }
   0x4   :  { %1287 = vmatpush3.bf16.msra.mxu0 %v1444_v6  ;;  %v47_v11 = vsub.s32 0, %v1449_v8  ;;  %1293 = vmatpush3.bf16.msra.mxu1 %v1444_v6  ;;  %v1487_v16 = vld [vmem:[%s1625_s3] ss:$0 sm:$0xff]  ;;  %v54_v30 = vsub.s32 1, %v1449_v8  ;;  %v61_v50 = vsub.s32 2, %v1449_v8 }
   0x5   :  { %1288 = vmatprep.subr.bf16.mxu0 %v1382_v1  ;;  %1294 = vmatprep.subr.bf16.mxu1 %v1382_v1 }
   0x6   :  { %v48_v12 = vrot.slane %v1457_v9, %v47_v11  ;;  %v55_v31 = vrot.slane %v1457_v9, %v54_v30  ;;  %v62_v51 = vrot.slane %v1457_v9, %v61_v50 }
   0x8   :  { %1290 = vmatpush3.bf16.msra.mxu0 %v1460_v10  ;;  %50 = vbcast.lane.b32.xlu0 %v48_v12, 256  ;;  %v68_v12 = vsub.s32 3, %v1449_v8 }
   0x9   :  { %1296 = vmatpush3.bf16.msra.mxu1 %v1460_v10  ;;  %1297 = vmatprep.subr.bf16.mxu0 %v1382_v1 }
   0xa   :  { %1303 = vmatprep.subr.bf16.mxu1 %v1382_v1 }
   0xb   :  { %1190 = vmatmul.mubr.f32.vlgmr.msra.gmra.mrb[0].mxu0 %v1384_v5 }
   0xc   :  { %1299 = vmatpush3.bf16.msra.mxu0 %v1444_v6  ;;  %1211 = vmatprep.mubr.msk.f32.mxu0 %vm1383_vm0, %v1384_v5 }
   0xd   :  { %1300 = vmatprep.subr.bf16.mxu0 %v1382_v1 }
  0x10   :  { %1302 = vmatpush3.bf16.msra.mxu0 %v1460_v10 }
  0x11   :  { %1309 = vmatprep.subr.bf16.mxu0 %v1382_v1 }
  0x7a   :  { %v51_v14 = vpop.permute.xlu0 %50 }
  0x7b   :  { %v107_v15 = vmul.f32 %v1481_v13, %v51_v14  ;;  %v69_v14 = vrot.slane %v1457_v9, %v68_v12 }
  0x7d   :  { %v121_v17 = vadd.f32 %v1487_v16, %v107_v15 }
  0xde   :  { %v199_v18 = vpop.f32.mrb[0].mxu0 }
  0xdf   :  { %v203_v19 = vadd.f32 %v199_v18, %v121_v17  ;;  %v1191_v20 = vpop.f32.mrb[1].mxu0 }
  0xe1   :  { %1346 = vtanh.f32 %v203_v19 }
  0xeb   :  { %v1347_v21 = vpop.eup %1346 }
  0xec   :  { %209 = vrot.lane.b32.xlu0 %v1347_v21, %s1385_s17  ;;  %v205_v22 = vmul.f32 0.5, %v1347_v21 }
  0xee   :  { %v206_v23 = vadd.f32 0.5, %v205_v22 }
  0xf0   :  { %v207_v26 = vmul.f32 0.0, %v206_v23 }
 0x15e   :  { %v210_v24 = vpop.permute.xlu0 %209 }
 0x15f   :  { %v212_v25 = vmul.f32 %v210_v24, %v206_v23 }
 0x161   :  { %214 = vrot.lane.b32.xlu1 %v212_v25, %s1386_s1 }
 0x1d3   :  { %v215_v27 = vpop.permute.xlu1 %214 }
 0x1d4   :  { %v217_v28 = vadd.f32 %v215_v27, %v207_v26 }
 0x1d6   :  { %1348 = vtanh.f32 %v217_v28 }
 0x1e0   :  { %v1349_v29 = vpop.eup %1348 }
 0x1e1   :  { %220 = vrot.lane.b32.xlu1 %v1349_v29, %s1385_s17 }
 0x1e5   :  { %57 = vbcast.lane.b32.xlu1 %v55_v31, 256 }
 0x253   :  { %v221_v32 = vpop.permute.xlu1 %220 }
 0x254   :  { %v223_v33 = vmul.f32 %v221_v32, %v206_v23 }
 0x256   :  { %225 = vrot.lane.b32.xlu0 %v223_v33, %s1386_s1 }
 0x257   :  { %v58_v35 = vpop.permute.xlu1 %57 }
 0x258   :  { %v108_v36 = vmul.f32 %v1481_v13, %v58_v35 }
 0x25a   :  { %v122_v37 = vadd.f32 %v1487_v16, %v108_v36 }
 0x2c8   :  { %v226_v34 = vpop.permute.xlu0 %225 }
 0x2c9   :  { %229 = vst.msk [vmem:[#allocation2] sm:$0x3] %vm228_vm1, %v226_v34  ;;  %1201 = vmatmul.mubr.msk.f32.vlgmr.msra.gmra.mrb[0].mxu1 %vm129_vm2, %v226_v34  ;;  %v75_v34 = vsub.s32 4, %v1449_v8 }
 0x2ca   :  { %1305 = vmatpush3.bf16.msra.mxu1 %v1444_v6  ;;  %1222 = vmatprep.mubr.msk.f32.mxu1 %vm1383_vm0, %v1384_v5 }
 0x2cb   :  { %1306 = vmatprep.subr.bf16.mxu1 %v1382_v1  ;;  %v76_v35 = vrot.slane %v1457_v9, %v75_v34 }
 0x2ce   :  { %1308 = vmatpush3.bf16.msra.mxu1 %v1460_v10 }
 0x2cf   :  { %1315 = vmatprep.subr.bf16.mxu1 %v1382_v1 }
 0x39c   :  { %v298_v38 = vpop.f32.mrb[0].mxu1 }
 0x39d   :  { %v302_v39 = vadd.f32 %v298_v38, %v122_v37  ;;  %v1202_v40 = vpop.f32.mrb[1].mxu1 }
 0x39f   :  { %1350 = vtanh.f32 %v302_v39 }
 0x3a9   :  { %v1351_v41 = vpop.eup %1350 }
 0x3aa   :  { %308 = vrot.lane.b32.xlu0 %v1351_v41, %s1385_s17  ;;  %v304_v42 = vmul.f32 0.5, %v1351_v41 }
 0x3ac   :  { %v305_v43 = vadd.f32 0.5, %v304_v42 }
 0x3ae   :  { %v306_v46 = vmul.f32 %v305_v43, %v217_v28 }
 0x41c   :  { %v309_v44 = vpop.permute.xlu0 %308 }
 0x41d   :  { %v311_v45 = vmul.f32 %v309_v44, %v305_v43 }
 0x41f   :  { %313 = vrot.lane.b32.xlu1 %v311_v45, %s1386_s1 }
 0x491   :  { %v314_v47 = vpop.permute.xlu1 %313 }
 0x492   :  { %v316_v48 = vadd.f32 %v314_v47, %v306_v46 }
 0x494   :  { %1352 = vtanh.f32 %v316_v48 }
 0x49e   :  { %v1353_v49 = vpop.eup %1352 }
 0x49f   :  { %319 = vrot.lane.b32.xlu0 %v1353_v49, %s1385_s17 }
 0x4a3   :  { %64 = vbcast.lane.b32.xlu0 %v62_v51, 256 }
 0x511   :  { %v320_v52 = vpop.permute.xlu0 %319 }
 0x512   :  { %v322_v53 = vmul.f32 %v320_v52, %v305_v43 }
 0x514   :  { %324 = vrot.lane.b32.xlu1 %v322_v53, %s1386_s1 }
 0x515   :  { %v65_v55 = vpop.permute.xlu0 %64 }
 0x516   :  { %v109_v56 = vmul.f32 %v1481_v13, %v65_v55 }
 0x518   :  { %v123_v57 = vadd.f32 %v1487_v16, %v109_v56 }
 0x586   :  { %v325_v54 = vpop.permute.xlu1 %324 }
 0x587   :  { %327 = vst.msk [vmem:[#allocation2 + $0x2] sm:$0x3] %vm228_vm1, %v325_v54  ;;  %1212 = vmatmul.mubr.msk.f32.vlgmr.msra.gmra.mrb[2].mxu0 %vm129_vm2, %v325_v54  ;;  %v82_v54 = vsub.s32 5, %v1449_v8 }
 0x588   :  { %1311 = vmatpush3.bf16.msra.mxu0 %v1444_v6  ;;  %1233 = vmatprep.mubr.msk.f32.mxu0 %vm1383_vm0, %v1384_v5 }
 0x589   :  { %1312 = vmatprep.subr.bf16.mxu0 %v1382_v1  ;;  %v83_v55 = vrot.slane %v1457_v9, %v82_v54  ;;  %v40_v54 = vld [vmem:[%s1626_s4 + $0x10] sm:$0xff] }
 0x58c   :  { %1314 = vmatpush3.bf16.msra.mxu0 %v1460_v10 }
 0x58d   :  { %1321 = vmatprep.subr.bf16.mxu0 %v1382_v1 }
 0x65a   :  { %v396_v58 = vpop.f32.mrb[2].mxu0 }
 0x65b   :  { %v400_v59 = vadd.f32 %v396_v58, %v123_v57  ;;  %v1213_v60 = vpop.f32.mrb[3].mxu0 }
 0x65d   :  { %1354 = vtanh.f32 %v400_v59 }
 0x667   :  { %v1355_v61 = vpop.eup %1354 }
 0x668   :  { %406 = vrot.lane.b32.xlu1 %v1355_v61, %s1385_s17  ;;  %v402_v62 = vmul.f32 0.5, %v1355_v61 }
 0x66a   :  { %v403_v63 = vadd.f32 0.5, %v402_v62 }
 0x66c   :  { %v404_v3 = vmul.f32 %v403_v63, %v316_v48 }
 0x6da   :  { %v407_v0 = vpop.permute.xlu1 %406 }
 0x6db   :  { %v409_v2 = vmul.f32 %v407_v0, %v403_v63 }
 0x6dd   :  { %411 = vrot.lane.b32.xlu0 %v409_v2, %s1386_s1 }
 0x74f   :  { %v412_v4 = vpop.permute.xlu0 %411 }
 0x750   :  { %v414_v7 = vadd.f32 %v412_v4, %v404_v3 }
 0x752   :  { %1356 = vtanh.f32 %v414_v7 }
 0x75c   :  { %v1357_v11 = vpop.eup %1356 }
 0x75d   :  { %417 = vrot.lane.b32.xlu1 %v1357_v11, %s1385_s17 }
 0x761   :  { %71 = vbcast.lane.b32.xlu1 %v69_v14, 256  ;;  %v89_v14 = vsub.s32 6, %v1449_v8 }
 0x7cf   :  { %v418_v15 = vpop.permute.xlu1 %417 }
 0x7d0   :  { %v420_v17 = vmul.f32 %v418_v15, %v403_v63  ;;  %v90_v15 = vrot.slane %v1457_v9, %v89_v14 }
 0x7d2   :  { %422 = vrot.lane.b32.xlu0 %v420_v17, %s1386_s1 }
 0x7d3   :  { %v72_v19 = vpop.permute.xlu1 %71 }
 0x7d4   :  { %v110_v20 = vmul.f32 %v1481_v13, %v72_v19 }
 0x7d6   :  { %v124_v21 = vadd.f32 %v1487_v16, %v110_v20 }
 0x844   :  { %v423_v18 = vpop.permute.xlu0 %422 }
 0x845   :  { %425 = vst.msk [vmem:[#allocation2 + $0x4] sm:$0x3] %vm228_vm1, %v423_v18  ;;  %1223 = vmatmul.mubr.msk.f32.vlgmr.msra.gmra.mrb[2].mxu1 %vm129_vm2, %v423_v18 }
 0x846   :  { %1317 = vmatpush3.bf16.msra.mxu1 %v1444_v6  ;;  %1244 = vmatprep.mubr.msk.f32.mxu1 %vm1383_vm0, %v1384_v5 }
 0x847   :  { %1318 = vmatprep.subr.bf16.mxu1 %v1382_v1 }
 0x84a   :  { %1320 = vmatpush3.bf16.msra.mxu1 %v1460_v10 }
 0x84b   :  { %1327 = vmatprep.subr.bf16.mxu1 %v1382_v1 }
 0x918   :  { %v494_v22 = vpop.f32.mrb[2].mxu1 }
 0x919   :  { %v498_v23 = vadd.f32 %v494_v22, %v124_v21  ;;  %v1224_v24 = vpop.f32.mrb[3].mxu1 }
 0x91b   :  { %1358 = vtanh.f32 %v498_v23 }
 0x925   :  { %v1359_v25 = vpop.eup %1358 }
 0x926   :  { %504 = vrot.lane.b32.xlu0 %v1359_v25, %s1385_s17  ;;  %v500_v26 = vmul.f32 0.5, %v1359_v25 }
 0x928   :  { %v501_v27 = vadd.f32 0.5, %v500_v26 }
 0x92a   :  { %v502_v30 = vmul.f32 %v501_v27, %v414_v7 }
 0x998   :  { %v505_v28 = vpop.permute.xlu0 %504 }
 0x999   :  { %v507_v29 = vmul.f32 %v505_v28, %v501_v27 }
 0x99b   :  { %509 = vrot.lane.b32.xlu1 %v507_v29, %s1386_s1 }
 0xa0d   :  { %v510_v31 = vpop.permute.xlu1 %509 }
 0xa0e   :  { %v512_v32 = vadd.f32 %v510_v31, %v502_v30 }
 0xa10   :  { %1360 = vtanh.f32 %v512_v32 }
 0xa1a   :  { %v1361_v33 = vpop.eup %1360 }
 0xa1b   :  { %515 = vrot.lane.b32.xlu0 %v1361_v33, %s1385_s17 }
 0xa1f   :  { %78 = vbcast.lane.b32.xlu0 %v76_v35, 256 }
 0xa8d   :  { %v516_v36 = vpop.permute.xlu0 %515 }
 0xa8e   :  { %v518_v37 = vmul.f32 %v516_v36, %v501_v27  ;;  %v96_v36 = vsub.s32 7, %v1449_v8 }
 0xa90   :  { %520 = vrot.lane.b32.xlu1 %v518_v37, %s1386_s1  ;;  %v97_v37 = vrot.slane %v1457_v9, %v96_v36 }
 0xa91   :  { %v79_v39 = vpop.permute.xlu0 %78 }
 0xa92   :  { %v111_v40 = vmul.f32 %v1481_v13, %v79_v39 }
 0xa94   :  { %v125_v41 = vadd.f32 %v1487_v16, %v111_v40 }
 0xb02   :  { %v521_v38 = vpop.permute.xlu1 %520 }
 0xb03   :  { %523 = vst.msk [vmem:[#allocation2 + $0x6] sm:$0x3] %vm228_vm1, %v521_v38  ;;  %1234 = vmatmul.mubr.msk.f32.vlgmr.msra.gmra.mrb[4].mxu0 %vm129_vm2, %v521_v38 }
 0xb04   :  { %1323 = vmatpush3.bf16.msra.mxu0 %v1444_v6  ;;  %1255 = vmatprep.mubr.msk.f32.mxu0 %vm1383_vm0, %v1384_v5 }
 0xb05   :  { %1324 = vmatprep.subr.bf16.mxu0 %v1382_v1 }
 0xb08   :  { %1326 = vmatpush3.bf16.msra.mxu0 %v1460_v10 }
 0xb0a   :  { %v916_v20 = vld [vmem:[#allocation2] sm:$0xff] }
 0xbd6   :  { %v592_v42 = vpop.f32.mrb[4].mxu0 }
 0xbd7   :  { %v596_v43 = vadd.f32 %v592_v42, %v125_v41  ;;  %v1235_v44 = vpop.f32.mrb[5].mxu0 }
 0xbd9   :  { %1362 = vtanh.f32 %v596_v43 }
 0xbe3   :  { %v1363_v45 = vpop.eup %1362 }
 0xbe4   :  { %602 = vrot.lane.b32.xlu1 %v1363_v45, %s1385_s17  ;;  %v598_v46 = vmul.f32 0.5, %v1363_v45 }
 0xbe6   :  { %v599_v47 = vadd.f32 0.5, %v598_v46 }
 0xbe8   :  { %v600_v50 = vmul.f32 %v599_v47, %v512_v32 }
 0xc56   :  { %v603_v48 = vpop.permute.xlu1 %602 }
 0xc57   :  { %v605_v49 = vmul.f32 %v603_v48, %v599_v47 }
 0xc59   :  { %607 = vrot.lane.b32.xlu0 %v605_v49, %s1386_s1 }
 0xccb   :  { %v608_v51 = vpop.permute.xlu0 %607 }
 0xccc   :  { %v610_v52 = vadd.f32 %v608_v51, %v600_v50 }
 0xcce   :  { %1364 = vtanh.f32 %v610_v52 }
 0xcd8   :  { %v1365_v53 = vpop.eup %1364 }
 0xcd9   :  { %613 = vrot.lane.b32.xlu1 %v1365_v53, %s1385_s17 }
 0xcdd   :  { %85 = vbcast.lane.b32.xlu1 %v83_v55, 256  ;;  %v41_v55 = vld [vmem:[%s1626_s4 + $0x18] sm:$0xff] }
 0xd4b   :  { %v614_v56 = vpop.permute.xlu1 %613 }
 0xd4c   :  { %v616_v57 = vmul.f32 %v614_v56, %v599_v47  ;;  %v1337_v56 = vpack.c.bf16 %v41_v55, %v40_v54 }
 0xd4e   :  { %618 = vrot.lane.b32.xlu0 %v616_v57, %s1386_s1 }
 0xd4f   :  { %v86_v59 = vpop.permute.xlu1 %85 }
 0xd50   :  { %v112_v60 = vmul.f32 %v1481_v13, %v86_v59 }
 0xd52   :  { %v126_v61 = vadd.f32 %v1487_v16, %v112_v60 }
 0xdc0   :  { %v619_v58 = vpop.permute.xlu0 %618 }
 0xdc1   :  { %621 = vst.msk [vmem:[#allocation2 + $0x8] sm:$0x3] %vm228_vm1, %v619_v58  ;;  %1245 = vmatmul.mubr.msk.f32.vlgmr.msra.gmra.mrb[4].mxu1 %vm129_vm2, %v619_v58 }
 0xdc2   :  { %1329 = vmatpush3.bf16.msra.mxu1 %v1444_v6  ;;  %1266 = vmatprep.mubr.msk.f32.mxu1 %vm1383_vm0, %v1384_v5 }
 0xdc3   :  { %1330 = vmatprep.subr.bf16.mxu1 %v1382_v1 }
 0xdc6   :  { %1332 = vmatpush3.bf16.msra.mxu1 %v1460_v10 }
 0xdc7   :  { %1280 = vmatprep.subr.mxu1 %v1384_v5 }
 0xe94   :  { %v690_v62 = vpop.f32.mrb[4].mxu1 }
 0xe95   :  { %v694_v63 = vadd.f32 %v690_v62, %v126_v61  ;;  %v1246_v0 = vpop.f32.mrb[5].mxu1  ;;  %v43_v61 = vld [vmem:[%s1627_s6] sm:$0x3f]  ;;  %v13_v62 = vstv %s1628_s7 }
 0xe96   :  { %14 = vst [vmem:[#allocation3] sm:$0x1] %v13_v62 }
 0xe97   :  { %1366 = vtanh.f32 %v694_v63  ;;  %v1127_v63 = vld [vmem:[%s1629_s5] ss:$0 sm:$0xff] }
 0xea1   :  { %v1367_v2 = vpop.eup %1366 }
 0xea2   :  { %700 = vrot.lane.b32.xlu0 %v1367_v2, %s1385_s17  ;;  %v696_v6 = vmul.f32 0.5, %v1367_v2 }
 0xea4   :  { %v697_v3 = vadd.f32 0.5, %v696_v6 }
 0xea6   :  { %v698_v10 = vmul.f32 %v697_v3, %v610_v52  ;;  %v39_v52 = vld [vmem:[%s1626_s4 + $0x8] sm:$0xff] }
 0xf14   :  { %v701_v4 = vpop.permute.xlu0 %700 }
 0xf15   :  { %v703_v1 = vmul.f32 %v701_v4, %v697_v3 }
 0xf17   :  { %705 = vrot.lane.b32.xlu1 %v703_v1, %s1386_s1 }
 0xf89   :  { %v706_v7 = vpop.permute.xlu1 %705 }
 0xf8a   :  { %v708_v11 = vadd.f32 %v706_v7, %v698_v10 }
 0xf8c   :  { %1368 = vtanh.f32 %v708_v11 }
 0xf96   :  { %v1369_v12 = vpop.eup %1368 }
 0xf97   :  { %711 = vrot.lane.b32.xlu0 %v1369_v12, %s1385_s17 }
 0xf9b   :  { %92 = vbcast.lane.b32.xlu0 %v90_v15, 256 }
0x1009   :  { %v712_v17 = vpop.permute.xlu0 %711 }
0x100a   :  { %v714_v18 = vmul.f32 %v712_v17, %v697_v3 }
0x100c   :  { %716 = vrot.lane.b32.xlu1 %v714_v18, %s1386_s1 }
0x100d   :  { %v93_v21 = vpop.permute.xlu0 %92 }
0x100e   :  { %v113_v22 = vmul.f32 %v1481_v13, %v93_v21 }
0x1010   :  { %v127_v23 = vadd.f32 %v1487_v16, %v113_v22 }
0x107e   :  { %v717_v19 = vpop.permute.xlu1 %716 }
0x107f   :  { %719 = vst.msk [vmem:[#allocation2 + $0xa] sm:$0x3] %vm228_vm1, %v717_v19  ;;  %1256 = vmatmul.mubr.msk.f32.vlgmr.msra.gmra.mrb[6].mxu0 %vm129_vm2, %v717_v19 }
0x1080   :  { %1277 = vmatprep.mubr.msk.f32.mxu0 %vm129_vm2, %v916_v20 }
0x1152   :  { %v788_v24 = vpop.f32.mrb[6].mxu0 }
0x1153   :  { %v792_v25 = vadd.f32 %v788_v24, %v127_v23  ;;  %v1257_v26 = vpop.f32.mrb[7].mxu0  ;;  %v1130_v24 = vld [vmem:[#allocation3] ss:$0 sm:$0xff] }
0x1155   :  { %1370 = vtanh.f32 %v792_v25 }
0x115f   :  { %v1371_v27 = vpop.eup %1370 }
0x1160   :  { %798 = vrot.lane.b32.xlu1 %v1371_v27, %s1385_s17  ;;  %v794_v28 = vmul.f32 0.5, %v1371_v27 }
0x1162   :  { %v795_v29 = vadd.f32 0.5, %v794_v28 }
0x1164   :  { %v796_v32 = vmul.f32 %v795_v29, %v708_v11 }
0x11d2   :  { %v799_v30 = vpop.permute.xlu1 %798 }
0x11d3   :  { %v801_v31 = vmul.f32 %v799_v30, %v795_v29 }
0x11d5   :  { %803 = vrot.lane.b32.xlu0 %v801_v31, %s1386_s1 }
0x1247   :  { %v804_v33 = vpop.permute.xlu0 %803 }
0x1248   :  { %v806_v34 = vadd.f32 %v804_v33, %v796_v32 }
0x124a   :  { %1372 = vtanh.f32 %v806_v34 }
0x1254   :  { %v1373_v35 = vpop.eup %1372 }
0x1255   :  { %809 = vrot.lane.b32.xlu1 %v1373_v35, %s1385_s17 }
0x1259   :  { %99 = vbcast.lane.b32.xlu1 %v97_v37, 256 }
0x12c7   :  { %v810_v38 = vpop.permute.xlu1 %809 }
0x12c8   :  { %v812_v39 = vmul.f32 %v810_v38, %v795_v29 }
0x12ca   :  { %814 = vrot.lane.b32.xlu0 %v812_v39, %s1386_s1 }
0x12cb   :  { %v100_v41 = vpop.permute.xlu1 %99 }
0x12cc   :  { %v114_v42 = vmul.f32 %v1481_v13, %v100_v41 }
0x12ce   :  { %v128_v8 = vadd.f32 %v1487_v16, %v114_v42  ;;  %v38_v16 = vld [vmem:[%s1626_s4] sm:$0xff] }
0x12cf   :  { %v1333_v53 = vpack.c.bf16 %v39_v52, %v38_v16 }
0x12d1   :  { %1334 = vmatprep.subr.bf16.mxu0 %v1333_v53 }
0x12d2   :  { %1336 = vmatpush3.bf16.msra.mxu0 %v1333_v53 }
0x12d3   :  { %1338 = vmatprep.subr.bf16.mxu0 %v1337_v56 }
0x12d6   :  { %1340 = vmatpush3.bf16.msra.mxu0 %v1337_v56 }
0x133c   :  { %v815_v40 = vpop.permute.xlu0 %814 }
0x133d   :  { %817 = vst.msk [vmem:[#allocation2 + $0xc] sm:$0x3] %vm228_vm1, %v815_v40  ;;  %1267 = vmatmul.mubr.msk.f32.vlgmr.msra.gmra.mrb[6].mxu1 %vm129_vm2, %v815_v40 }
0x133e   :  { %1282 = vmatprep.mubr.msk.f32.mxu1 %vm1383_vm0, %v1384_v5  ;;  %1281 = vmatpush3.msk.msra.mxu1 %vm1038_vm3, %v43_v61 }
0x1410   :  { %v886_v43 = vpop.f32.mrb[6].mxu1 }
0x1411   :  { %v890_v9 = vadd.f32 %v886_v43, %v128_v8  ;;  %v1268_v44 = vpop.f32.mrb[7].mxu1 }
0x1413   :  { %1374 = vtanh.f32 %v890_v9 }
0x141d   :  { %v1375_v45 = vpop.eup %1374 }
0x141e   :  { %896 = vrot.lane.b32.xlu0 %v1375_v45, %s1385_s17  ;;  %v892_v46 = vmul.f32 0.5, %v1375_v45 }
0x1420   :  { %v893_v47 = vadd.f32 0.5, %v892_v46 }
0x1422   :  { %v894_v50 = vmul.f32 %v893_v47, %v806_v34 }
0x1490   :  { %v897_v48 = vpop.permute.xlu0 %896 }
0x1491   :  { %v899_v49 = vmul.f32 %v897_v48, %v893_v47 }
0x1493   :  { %901 = vrot.lane.b32.xlu1 %v899_v49, %s1386_s1 }
0x1505   :  { %v902_v5 = vpop.permute.xlu1 %901 }
0x1506   :  { %v904_v51 = vadd.f32 %v902_v5, %v894_v50 }
0x1508   :  { %1376 = vtanh.f32 %v904_v51 }
0x1512   :  { %v1377_v13 = vpop.eup %1376 }
0x1513   :  { %907 = vrot.lane.b32.xlu0 %v1377_v13, %s1385_s17 }
0x1585   :  { %v908_v57 = vpop.permute.xlu0 %907 }
0x1586   :  { %v910_v58 = vmul.f32 %v908_v57, %v893_v47 }
0x1588   :  { %912 = vrot.lane.b32.xlu1 %v910_v58, %s1386_s1 }
0x15fa   :  { %v913_v59 = vpop.permute.xlu1 %912 }
0x15fb   :  { %915 = vst.msk [vmem:[#allocation2 + $0xe] sm:$0x3] %vm228_vm1, %v913_v59 }
0x1602   :  { %v917_v60 = vld [vmem:[#allocation2 + $0x8] sm:$0xff] }
0x1603   :  { %1278 = vmatmul.mubr.msk.f32.vlgmr.msra.gmra.mrb[8].mxu0 %vm129_vm2, %v917_v60 }
0x16d6   :  { %v1279_v0 = vpop.f32.mrb[8].mxu0 }
0x16d7   :  { %v996_v2 = vpop.f32.mrb[9].mxu0  ;;  %v1002_v3 = vadd.f32 %v1279_v0, %v1127_v63 }
0x16d8   :  { %v997_v6 = vadd.f32 %v1127_v63, %v996_v2 }
0x16da   :  { %1378 = vtanh.f32 %v997_v6 }
0x16db   :  { %1380 = vtanh.f32 %v1002_v3 }
0x16e4   :  { %v1379_v4 = vpop.eup %1378 }
0x16e5   :  { %v1008_v1 = vrot.slane %v1379_v4, 2  ;;  %v1011_v7 = vrot.slane %v1379_v4, 4  ;;  %v1014_v12 = vrot.slane %v1379_v4, 6  ;;  %v1381_v14 = vpop.eup %1380 }
0x16e6   :  { %v1019_v18 = vrot.slane %v1381_v14, 2  ;;  %v1022_v20 = vrot.slane %v1381_v14, 4  ;;  %v1025_v22 = vrot.slane %v1381_v14, 6 }
0x16e7   :  { %v1010_v10 = vadd.f32 %v1379_v4, %v1008_v1 }
0x16e9   :  { %v1013_v11 = vadd.f32 %v1011_v7, %v1010_v10 }
0x16eb   :  { %v1016_v15 = vadd.f32 %v1014_v12, %v1013_v11 }
0x16ed   :  { %v1017_v17 = vadd.f32 %v1381_v14, %v1016_v15 }
0x16ef   :  { %v1021_v19 = vadd.f32 %v1019_v18, %v1017_v17 }
0x16f1   :  { %v1024_v21 = vadd.f32 %v1022_v20, %v1021_v19 }
0x16f3   :  { %v1027_v23 = vadd.f32 %v1025_v22, %v1024_v21 }
0x16f5   :  { %1283 = vmatmul.mubr.msk.f32.vlgmr.msra.gmra.mrb[8].mxu1 %vm1034_vm4, %v1027_v23 }
0x17c8   :  { %v1108_v25 = vpop.f32.mrb[8].mxu1 }
0x17c9   :  { %v1109_v26 = vadd.f32 %v1130_v24, %v1108_v25  ;;  %v1284_v27 = vpop.f32.mrb[9].mxu1 }
0x17cb   :  { %1113 = vst.msk [vmem:[%s1630_s8] sm:$0x3] %vm1112_vm5, %v1109_v26 }

</bundles_post_ra>
